<compile_context>
chip_gen: v7x
topology: tpu7x:2x2x1
jax: 0.10.0
libtpu: 0.0.40
codegen_flags: <defaults>
</compile_context>

<pallas_src>
import functools

import jax
import jax.numpy as jnp
from jax.experimental import pallas as pl
from jax.experimental.pallas import tpu as pltpu

BN_EPS = 1e-5


def _round_up(a: int, b: int) -> int:
    return (a + b - 1) // b * b


def _hw_defaults():
    """Best-effort per-generation static defaults (pure Python, trace time)."""
    kind = ""
    try:
        kind = jax.devices()[0].device_kind.lower()
    except Exception:
        pass
    is_v7 = "v7" in kind
    is_v5 = "v5" in kind
    is_v6 = "v6" in kind
    block_hidden = 256 if is_v7 else 512      # v7x: halve slabs, 64 MiB VMEM
    num_splits = 2 if is_v7 else 1            # v7x: 2 TensorCores / chip
    if is_v5 or is_v6:
        vmem_limit = 100 << 20                # 128 MiB physical VMEM
    else:
        vmem_limit = 48 << 20                 # safe on v7x / unknown targets
    return block_hidden, num_splits, vmem_limit, is_v5


def _make_kernel(inv_n: float, steps_per_split: int):
    def kernel(x_ref, w1_ref, gb_ref, w2_ref, o_ref):
        c = pl.program_id(0)                  # core split (parallel)
        k = pl.program_id(1)                  # hidden tile within split

        @pl.when(k == 0)
        def _():
            o_ref[...] = jnp.zeros_like(o_ref)

        # l1 tile: (Np, in_dim) @ (in_dim, TH) -> (Np, TH); native dtype on
        # the MXU, f32 accumulation.
        h = jnp.dot(x_ref[...], w1_ref[...], preferred_element_type=jnp.float32)
        h = jnp.maximum(h, 0.0)                           # ReLU (VPU)

        # BatchNorm1d training-mode stats (biased variance), one-pass f32.
        # Zero-padded batch rows contribute 0 to the sums; divide by TRUE N
        # via the trace-time constant inv_n (no runtime divides).
        s1 = jnp.sum(h, axis=0, keepdims=True)            # (1, TH)
        s2 = jnp.sum(h * h, axis=0, keepdims=True)        # (1, TH)
        mean = s1 * inv_n
        var = jnp.maximum(s2 * inv_n - mean * mean, 0.0)
        inv_std = jax.lax.rsqrt(var + BN_EPS)             # EUP

        # gamma/beta: resident VMEM table, one dynamic leading-axis load per
        # tile instead of two per-step DMAs.
        gb = gb_ref[c * steps_per_split + k]              # (2, TH) f32
        scale = gb[0:1, :] * inv_std
        shift = gb[1:2, :] - mean * scale
        h_bn = h * scale + shift                          # single FMA pass

        # l2 tile: (Np, TH) @ (TH, out_dim_p), accumulated directly into the
        # resident f32 output block (no separate scratch accumulator).
        w2 = w2_ref[...]
        o_ref[...] += jnp.dot(h_bn.astype(w2.dtype), w2,
                              preferred_element_type=jnp.float32)

    return kernel


@functools.partial(
    jax.jit,
    static_argnames=("th", "num_splits", "vmem_limit", "w1_buffers", "single_buffer"))
def _projector_impl(x, w1, gamma, beta, w2, *, th, num_splits, vmem_limit,
                    w1_buffers, single_buffer):
    n, in_dim = x.shape
    hidden = w1.shape[1]
    out_dim = w2.shape[1]

    # Hidden tile: lane-aligned, no bigger than (padded) hidden.
    th = _round_up(min(max(th, 128), _round_up(hidden, 128)), 128)
    n_tiles = _round_up(hidden, th) // th
    if n_tiles < num_splits:                  # not enough tiles to split cores
        num_splits = 1
    sps = _round_up(n_tiles, num_splits) // num_splits   # steps per split
    n_tiles_total = sps * num_splits
    hidden_p = n_tiles_total * th

    out_dim_p = _round_up(out_dim, 128)       # lane-dense output stores
    n_p = _round_up(n, 8)                     # sublane-dense batch

    # Zero padding, only when shapes are actually ragged (trace-time check).
    # Padded hidden features have gamma=beta=0 and zero w2 rows -> exact 0;
    # padded batch rows are zero -> contribute 0 to BN sums (divisor = true N)
    # and are sliced off the output.
    if n_p != n:
        x = jnp.pad(x, ((0, n_p - n), (0, 0)))
    if hidden_p != hidden:
        w1 = jnp.pad(w1, ((0, 0), (0, hidden_p - hidden)))
        gamma = jnp.pad(gamma, (0, hidden_p - hidden))
        beta = jnp.pad(beta, (0, hidden_p - hidden))
        w2 = jnp.pad(w2, ((0, hidden_p - hidden), (0, 0)))
    if out_dim_p != out_dim:
        w2 = jnp.pad(w2, ((0, 0), (0, out_dim_p - out_dim)))

    # gamma/beta packed per hidden tile: (n_tiles_total, 2, TH), f32, resident.
    gb = jnp.stack([gamma.reshape(n_tiles_total, th),
                    beta.reshape(n_tiles_total, th)], axis=1).astype(jnp.float32)

    resident = {"pipeline_mode": pl.Buffered(1)} if single_buffer else {}
    w1_pipe = ({"pipeline_mode": pl.Buffered(w1_buffers)}
               if (single_buffer and w1_buffers != 2) else {})

    grid_spec = pltpu.PrefetchScalarGridSpec(
        num_scalar_prefetch=0,
        grid=(num_splits, sps),
        in_specs=[
            # x: grid-invariant resident block (no re-DMA, single buffer).
            pl.BlockSpec((n_p, in_dim), lambda c, k: (0, 0), **resident),
            # w1 slab: streamed over the hidden axis (double/triple buffered).
            pl.BlockSpec((in_dim, th), lambda c, k: (0, c * sps + k), **w1_pipe),
            # gamma/beta table: whole thing resident, sliced in-kernel.
            pl.BlockSpec((n_tiles_total, 2, th), lambda c, k: (0, 0, 0),
                         **resident),
            # w2 slab: streamed over the hidden axis.
            pl.BlockSpec((th, out_dim_p), lambda c, k: (c * sps + k, 0)),
        ],
        # One resident f32 partial-output block per core split (accumulator).
        out_specs=pl.BlockSpec((None, n_p, out_dim_p), lambda c, k: (c, 0, 0),
                               **resident),
    )

    out_p = pl.pallas_call(
        _make_kernel(1.0 / float(n), sps),
        out_shape=jax.ShapeDtypeStruct((num_splits, n_p, out_dim_p), jnp.float32),
        grid_spec=grid_spec,
        compiler_params=pltpu.CompilerParams(
            dimension_semantics=("parallel", "arbitrary"),  # hidden axis = reduction
            vmem_limit_bytes=vmem_limit,
        ),
    )(x, w1, gb, w2)

    out = out_p[0] if num_splits == 1 else jnp.sum(out_p, axis=0)
    return out[:n, :out_dim].astype(x.dtype)


def projector(x, w1, gamma, beta, w2, *, block_hidden=None):
    """x:(N,in_dim), w1:(in_dim,hidden), gamma/beta:(hidden,), w2:(hidden,out_dim)."""
    bh_default, num_splits, vmem_limit, is_v5 = _hw_defaults()
    th = block_hidden if block_hidden is not None else bh_default
    # v5e small-batch: w1 stream is HBM-bound; a third buffer hides DMA jitter.
    w1_buffers = 3 if (is_v5 and x.shape[0] < 256) else 2
    try:
        return _projector_impl(x, w1, gamma, beta, w2, th=th,
                               num_splits=num_splits, vmem_limit=vmem_limit,
                               w1_buffers=w1_buffers, single_buffer=True)
    except Exception:
        # Fallback: default (double-buffered) BlockSpecs if this build rejects
        # pipeline_mode hints.
        return _projector_impl(x, w1, gamma, beta, w2, th=th,
                               num_splits=num_splits, vmem_limit=vmem_limit,
                               w1_buffers=2, single_buffer=False)


def projector_ref(x, w1, gamma, beta, w2):
    h = jnp.maximum(x @ w1, 0.0)
    mean = h.mean(axis=0, keepdims=True)
    var = ((h - mean) ** 2).mean(axis=0, keepdims=True)
    h_bn = (h - mean) / jnp.sqrt(var + BN_EPS) * gamma[None, :] + beta[None, :]
    return h_bn @ w2


if __name__ == "__main__":
    key = jax.random.PRNGKey(0)
    kx, k1, k2 = jax.random.split(key, 3)

    # Case 1: lane-dense shapes, block_hidden=128 -> multiple hidden tiles,
    # exercising the K-reduction accumulator (and the core split on v7x).
    N, IN_DIM, HIDDEN, OUT_DIM = 8, 128, 256, 128
    x = jax.random.normal(kx, (N, IN_DIM), dtype=jnp.float32)
    w1 = jax.random.normal(k1, (IN_DIM, HIDDEN), dtype=jnp.float32) * 0.05
    w2 = jax.random.normal(k2, (HIDDEN, OUT_DIM), dtype=jnp.float32) * 0.05
    gamma = jnp.ones((HIDDEN,), dtype=jnp.float32)
    beta = jnp.zeros((HIDDEN,), dtype=jnp.float32)

    out = jax.block_until_ready(projector(x, w1, gamma, beta, w2, block_hidden=128))
    ref = projector_ref(x, w1, gamma, beta, w2)
    assert out.shape == (N, OUT_DIM)
    assert jnp.allclose(out, ref, atol=1e-4, rtol=1e-4), "case 1 mismatch"

    # Case 2: ragged N / hidden / out_dim exercise every zero-padding path.
    N2, IN2, H2, O2 = 6, 40, 200, 48
    x2 = jax.random.normal(kx, (N2, IN2), dtype=jnp.float32)
    w1b = jax.random.normal(k1, (IN2, H2), dtype=jnp.float32) * 0.05
    w2b = jax.random.normal(k2, (H2, O2), dtype=jnp.float32) * 0.05
    gamma2 = jnp.linspace(0.5, 1.5, H2, dtype=jnp.float32)
    beta2 = jnp.linspace(-0.2, 0.2, H2, dtype=jnp.float32)

    out2 = jax.block_until_ready(projector(x2, w1b, gamma2, beta2, w2b))
    ref2 = projector_ref(x2, w1b, gamma2, beta2, w2b)
    assert out2.shape == (N2, O2)
    assert jnp.allclose(out2, ref2, atol=1e-4, rtol=1e-4), "case 2 mismatch"

    print("KERNEL_OK")
</pallas_src>

<mosaic_0001>
module attributes {stable_mosaic.version = 11 : i64} {
  func.func @kernel(%arg0: i32, %arg1: i32, %arg2: memref<8x128xf32, #tpu.memory_space<vmem>>, %arg3: memref<128x128xf32, #tpu.memory_space<vmem>>, %arg4: memref<2x2x128xf32, #tpu.memory_space<vmem>>, %arg5: memref<128x128xf32, #tpu.memory_space<vmem>>, %arg6: memref<1x8x128xf32, #tpu.memory_space<vmem>>) attributes {dimension_semantics = [#tpu.dimension_semantics<parallel>, #tpu.dimension_semantics<arbitrary>], iteration_bounds = array<i64: 1, 2>, scalar_prefetch = 0 : i64, scratch_operands = 0 : i64, tpu.core_type = #tpu.core_type<tc>, window_params = [{pipeline_mode = #tpu.pipeline_mode<synchronous>, transform_indices = @transform_0, window_bounds = array<i64: 8, 128>}, {transform_indices = @transform_1, window_bounds = array<i64: 128, 128>}, {pipeline_mode = #tpu.pipeline_mode<synchronous>, transform_indices = @transform_2, window_bounds = array<i64: 2, 2, 128>}, {transform_indices = @transform_3, window_bounds = array<i64: 128, 128>}, {pipeline_mode = #tpu.pipeline_mode<synchronous>, transform_indices = @transform_4, window_bounds = array<i64: 1, 8, 128>}]} {
    %c0_i32 = arith.constant 0 : i32
    %0 = arith.cmpi eq, %arg1, %c0_i32 : i32
    %1 = arith.extui %0 : i1 to i32
    %c0_i32_0 = arith.constant 0 : i32
    %2 = arith.cmpi ne, %1, %c0_i32_0 : i32
    scf.if %2 {
      %cst_22 = arith.constant 0.000000e+00 : f32
      %46 = vector.broadcast %cst_22 : f32 to vector<8x128xf32>
      %c0_23 = arith.constant 0 : index
      %c0_24 = arith.constant 0 : index
      %c0_25 = arith.constant 0 : index
      %47 = vector.load %arg6[%c0_23, %c0_24, %c0_25] : memref<1x8x128xf32, #tpu.memory_space<vmem>>, vector<1x8x128xf32>
      %48 = vector.shape_cast %47 : vector<1x8x128xf32> to vector<8x128xf32>
      %49 = vector.shape_cast %46 : vector<8x128xf32> to vector<1x8x128xf32>
      tpu.vector_store %arg6[%c0_23, %c0_24, %c0_25], %49 {strides = array<i32>} : memref<1x8x128xf32, #tpu.memory_space<vmem>>, vector<1x8x128xf32>,
    } else {
    }
    %c0 = arith.constant 0 : index
    %c0_1 = arith.constant 0 : index
    %3 = vector.load %arg2[%c0, %c0_1] : memref<8x128xf32, #tpu.memory_space<vmem>>, vector<8x128xf32>
    %c0_2 = arith.constant 0 : index
    %c0_3 = arith.constant 0 : index
    %4 = vector.load %arg3[%c0_2, %c0_3] : memref<128x128xf32, #tpu.memory_space<vmem>>, vector<128x128xf32>
    %cst = arith.constant dense<0.000000e+00> : vector<8x128xf32>
    %5 = tpu.matmul %3, %4, %cst {dimension_numbers = #tpu.dot_dimension_numbers<[1], [0], [0], [1], [0, 0, 1, 1], [], []>} : vector<8x128xf32>, vector<128x128xf32>, vector<8x128xf32> -> vector<8x128xf32>
    %cst_4 = arith.constant 0.000000e+00 : f32
    %6 = vector.broadcast %cst_4 : f32 to vector<8x128xf32>
    %7 = arith.maximumf %5, %6 : vector<8x128xf32>
    %cst_5 = arith.constant dense<0.000000e+00> : vector<128xf32>
    %8 = vector.multi_reduction <add>, %7, %cst_5 [0] : vector<8x128xf32> to vector<128xf32>
    %9 = vector.shape_cast %8 : vector<128xf32> to vector<1x128xf32>
    %10 = arith.mulf %7, %7 : vector<8x128xf32>
    %cst_6 = arith.constant dense<0.000000e+00> : vector<128xf32>
    %11 = vector.multi_reduction <add>, %10, %cst_6 [0] : vector<8x128xf32> to vector<128xf32>
    %12 = vector.shape_cast %11 : vector<128xf32> to vector<1x128xf32>
    %cst_7 = arith.constant 1.250000e-01 : f32
    %13 = vector.broadcast %cst_7 : f32 to vector<1x128xf32>
    %14 = arith.mulf %9, %13 : vector<1x128xf32>
    %cst_8 = arith.constant 1.250000e-01 : f32
    %15 = vector.broadcast %cst_8 : f32 to vector<1x128xf32>
    %16 = arith.mulf %12, %15 : vector<1x128xf32>
    %17 = arith.mulf %14, %14 : vector<1x128xf32>
    %18 = arith.subf %16, %17 : vector<1x128xf32>
    %cst_9 = arith.constant 0.000000e+00 : f32
    %19 = vector.broadcast %cst_9 : f32 to vector<1x128xf32>
    %20 = arith.maximumf %18, %19 : vector<1x128xf32>
    %cst_10 = arith.constant 9.99999974E-6 : f32
    %21 = vector.broadcast %cst_10 : f32 to vector<1x128xf32>
    %22 = arith.addf %20, %21 : vector<1x128xf32>
    %23 = math.rsqrt %22 : vector<1x128xf32>
    %c2_i32 = arith.constant 2 : i32
    %24 = arith.muli %arg0, %c2_i32 : i32
    %25 = arith.addi %24, %arg1 : i32
    %26 = arith.index_cast %25 : i32 to index
    %c0_11 = arith.constant 0 : index
    %c0_12 = arith.constant 0 : index
    %27 = vector.load %arg4[%26, %c0_11, %c0_12] : memref<2x2x128xf32, #tpu.memory_space<vmem>>, vector<1x2x128xf32>
    %28 = vector.shape_cast %27 : vector<1x2x128xf32> to vector<2x128xf32>
    %29 = vector.extract_strided_slice %28 {offsets = [0, 0], sizes = [1, 128], strides = [1, 1]} : vector<2x128xf32> to vector<1x128xf32>
    %30 = arith.mulf %29, %23 : vector<1x128xf32>
    %31 = vector.extract_strided_slice %28 {offsets = [1, 0], sizes = [1, 128], strides = [1, 1]} : vector<2x128xf32> to vector<1x128xf32>
    %32 = arith.mulf %14, %30 : vector<1x128xf32>
    %33 = arith.subf %31, %32 : vector<1x128xf32>
    %34 = vector.broadcast %30 : vector<1x128xf32> to vector<8x128xf32>
    %35 = arith.mulf %7, %34 : vector<8x128xf32>
    %36 = vector.broadcast %33 : vector<1x128xf32> to vector<8x128xf32>
    %37 = arith.addf %35, %36 : vector<8x128xf32>
    %c0_13 = arith.constant 0 : index
    %c0_14 = arith.constant 0 : index
    %38 = vector.load %arg5[%c0_13, %c0_14] : memref<128x128xf32, #tpu.memory_space<vmem>>, vector<128x128xf32>
    %c0_15 = arith.constant 0 : index
    %c0_16 = arith.constant 0 : index
    %c0_17 = arith.constant 0 : index
    %39 = vector.load %arg6[%c0_15, %c0_16, %c0_17] : memref<1x8x128xf32, #tpu.memory_space<vmem>>, vector<1x8x128xf32>
    %40 = vector.shape_cast %39 : vector<1x8x128xf32> to vector<8x128xf32>
    %cst_18 = arith.constant dense<0.000000e+00> : vector<8x128xf32>
    %41 = tpu.matmul %37, %38, %cst_18 {dimension_numbers = #tpu.dot_dimension_numbers<[1], [0], [0], [1], [0, 0, 1, 1], [], []>} : vector<8x128xf32>, vector<128x128xf32>, vector<8x128xf32> -> vector<8x128xf32>
    %42 = arith.addf %40, %41 : vector<8x128xf32>
    %c0_19 = arith.constant 0 : index
    %c0_20 = arith.constant 0 : index
    %c0_21 = arith.constant 0 : index
    %43 = vector.load %arg6[%c0_19, %c0_20, %c0_21] : memref<1x8x128xf32, #tpu.memory_space<vmem>>, vector<1x8x128xf32>
    %44 = vector.shape_cast %43 : vector<1x8x128xf32> to vector<8x128xf32>
    %45 = vector.shape_cast %42 : vector<8x128xf32> to vector<1x8x128xf32>
    tpu.vector_store %arg6[%c0_19, %c0_20, %c0_21], %45 {strides = array<i32>} : memref<1x8x128xf32, #tpu.memory_space<vmem>>, vector<1x8x128xf32>,
    return
  }
  func.func @transform_0(%arg0: i32, %arg1: i32) -> (i32, i32) {
    %c0_i32 = arith.constant 0 : i32
    %c0_i32_0 = arith.constant 0 : i32
    %c0_i32_1 = arith.constant 0 : i32
    return %c0_i32, %c0_i32_0 : i32, i32
  }
  func.func @transform_1(%arg0: i32, %arg1: i32) -> (i32, i32) {
    %c2_i32 = arith.constant 2 : i32
    %0 = arith.muli %arg0, %c2_i32 : i32
    %1 = arith.addi %0, %arg1 : i32
    %c0_i32 = arith.constant 0 : i32
    %c0_i32_0 = arith.constant 0 : i32
    return %c0_i32, %1 : i32, i32
  }
  func.func @transform_2(%arg0: i32, %arg1: i32) -> (i32, i32, i32) {
    %c0_i32 = arith.constant 0 : i32
    %c0_i32_0 = arith.constant 0 : i32
    %c0_i32_1 = arith.constant 0 : i32
    %c0_i32_2 = arith.constant 0 : i32
    return %c0_i32, %c0_i32_0, %c0_i32_1 : i32, i32, i32
  }
  func.func @transform_3(%arg0: i32, %arg1: i32) -> (i32, i32) {
    %c2_i32 = arith.constant 2 : i32
    %0 = arith.muli %arg0, %c2_i32 : i32
    %1 = arith.addi %0, %arg1 : i32
    %c0_i32 = arith.constant 0 : i32
    %c0_i32_0 = arith.constant 0 : i32
    return %1, %c0_i32 : i32, i32
  }
  func.func @transform_4(%arg0: i32, %arg1: i32) -> (i32, i32, i32) {
    %c0_i32 = arith.constant 0 : i32
    %c0_i32_0 = arith.constant 0 : i32
    %c0_i32_1 = arith.constant 0 : i32
    return %arg0, %c0_i32, %c0_i32_0 : i32, i32, i32
  }
}

module attributes {stable_mosaic.version = 11 : i64} {
  func.func @kernel(%arg0: i32, %arg1: i32, %arg2: memref<8x128xf32, #tpu.memory_space<vmem>>, %arg3: memref<128x128xf32, #tpu.memory_space<vmem>>, %arg4: memref<2x2x128xf32, #tpu.memory_space<vmem>>, %arg5: memref<128x128xf32, #tpu.memory_space<vmem>>, %arg6: memref<1x8x128xf32, #tpu.memory_space<vmem>>) attributes {dimension_semantics = [#tpu.dimension_semantics<parallel>, #tpu.dimension_semantics<arbitrary>], iteration_bounds = array<i64: 1, 2>, scalar_prefetch = 0 : i64, scratch_operands = 0 : i64, tpu.core_type = #tpu.core_type<tc>, window_params = [{pipeline_mode = #tpu.pipeline_mode<synchronous>, transform_indices = @transform_0, window_bounds = array<i64: 8, 128>}, {transform_indices = @transform_1, window_bounds = array<i64: 128, 128>}, {pipeline_mode = #tpu.pipeline_mode<synchronous>, transform_indices = @transform_2, window_bounds = array<i64: 2, 2, 128>}, {transform_indices = @transform_3, window_bounds = array<i64: 128, 128>}, {transform_indices = @transform_4, window_bounds = array<i64: 1, 8, 128>}]} {
    %c0_i32 = arith.constant 0 : i32
    %0 = arith.cmpi eq, %arg1, %c0_i32 : i32
    %1 = arith.extui %0 : i1 to i32
    %c0_i32_0 = arith.constant 0 : i32
    %2 = arith.cmpi ne, %1, %c0_i32_0 : i32
    scf.if %2 {
      %cst_22 = arith.constant 0.000000e+00 : f32
      %46 = vector.broadcast %cst_22 : f32 to vector<8x128xf32>
      %c0_23 = arith.constant 0 : index
      %c0_24 = arith.constant 0 : index
      %c0_25 = arith.constant 0 : index
      %47 = vector.load %arg6[%c0_23, %c0_24, %c0_25] : memref<1x8x128xf32, #tpu.memory_space<vmem>>, vector<1x8x128xf32>
      %48 = vector.shape_cast %47 : vector<1x8x128xf32> to vector<8x128xf32>
      %49 = vector.shape_cast %46 : vector<8x128xf32> to vector<1x8x128xf32>
      tpu.vector_store %arg6[%c0_23, %c0_24, %c0_25], %49 {strides = array<i32>} : memref<1x8x128xf32, #tpu.memory_space<vmem>>, vector<1x8x128xf32>,
    } else {
    }
    %c0 = arith.constant 0 : index
    %c0_1 = arith.constant 0 : index
    %3 = vector.load %arg2[%c0, %c0_1] : memref<8x128xf32, #tpu.memory_space<vmem>>, vector<8x128xf32>
    %c0_2 = arith.constant 0 : index
    %c0_3 = arith.constant 0 : index
    %4 = vector.load %arg3[%c0_2, %c0_3] : memref<128x128xf32, #tpu.memory_space<vmem>>, vector<128x128xf32>
    %cst = arith.constant dense<0.000000e+00> : vector<8x128xf32>
    %5 = tpu.matmul %3, %4, %cst {dimension_numbers = #tpu.dot_dimension_numbers<[1], [0], [0], [1], [0, 0, 1, 1], [], []>} : vector<8x128xf32>, vector<128x128xf32>, vector<8x128xf32> -> vector<8x128xf32>
    %cst_4 = arith.constant 0.000000e+00 : f32
    %6 = vector.broadcast %cst_4 : f32 to vector<8x128xf32>
    %7 = arith.maximumf %5, %6 : vector<8x128xf32>
    %cst_5 = arith.constant dense<0.000000e+00> : vector<128xf32>
    %8 = vector.multi_reduction <add>, %7, %cst_5 [0] : vector<8x128xf32> to vector<128xf32>
    %9 = vector.shape_cast %8 : vector<128xf32> to vector<1x128xf32>
    %10 = arith.mulf %7, %7 : vector<8x128xf32>
    %cst_6 = arith.constant dense<0.000000e+00> : vector<128xf32>
    %11 = vector.multi_reduction <add>, %10, %cst_6 [0] : vector<8x128xf32> to vector<128xf32>
    %12 = vector.shape_cast %11 : vector<128xf32> to vector<1x128xf32>
    %cst_7 = arith.constant 1.250000e-01 : f32
    %13 = vector.broadcast %cst_7 : f32 to vector<1x128xf32>
    %14 = arith.mulf %9, %13 : vector<1x128xf32>
    %cst_8 = arith.constant 1.250000e-01 : f32
    %15 = vector.broadcast %cst_8 : f32 to vector<1x128xf32>
    %16 = arith.mulf %12, %15 : vector<1x128xf32>
    %17 = arith.mulf %14, %14 : vector<1x128xf32>
    %18 = arith.subf %16, %17 : vector<1x128xf32>
    %cst_9 = arith.constant 0.000000e+00 : f32
    %19 = vector.broadcast %cst_9 : f32 to vector<1x128xf32>
    %20 = arith.maximumf %18, %19 : vector<1x128xf32>
    %cst_10 = arith.constant 9.99999974E-6 : f32
    %21 = vector.broadcast %cst_10 : f32 to vector<1x128xf32>
    %22 = arith.addf %20, %21 : vector<1x128xf32>
    %23 = math.rsqrt %22 : vector<1x128xf32>
    %c2_i32 = arith.constant 2 : i32
    %24 = arith.muli %arg0, %c2_i32 : i32
    %25 = arith.addi %24, %arg1 : i32
    %26 = arith.index_cast %25 : i32 to index
    %c0_11 = arith.constant 0 : index
    %c0_12 = arith.constant 0 : index
    %27 = vector.load %arg4[%26, %c0_11, %c0_12] : memref<2x2x128xf32, #tpu.memory_space<vmem>>, vector<1x2x128xf32>
    %28 = vector.shape_cast %27 : vector<1x2x128xf32> to vector<2x128xf32>
    %29 = vector.extract_strided_slice %28 {offsets = [0, 0], sizes = [1, 128], strides = [1, 1]} : vector<2x128xf32> to vector<1x128xf32>
    %30 = arith.mulf %29, %23 : vector<1x128xf32>
    %31 = vector.extract_strided_slice %28 {offsets = [1, 0], sizes = [1, 128], strides = [1, 1]} : vector<2x128xf32> to vector<1x128xf32>
    %32 = arith.mulf %14, %30 : vector<1x128xf32>
    %33 = arith.subf %31, %32 : vector<1x128xf32>
    %34 = vector.broadcast %30 : vector<1x128xf32> to vector<8x128xf32>
    %35 = arith.mulf %7, %34 : vector<8x128xf32>
    %36 = vector.broadcast %33 : vector<1x128xf32> to vector<8x128xf32>
    %37 = arith.addf %35, %36 : vector<8x128xf32>
    %c0_13 = arith.constant 0 : index
    %c0_14 = arith.constant 0 : index
    %38 = vector.load %arg5[%c0_13, %c0_14] : memref<128x128xf32, #tpu.memory_space<vmem>>, vector<128x128xf32>
    %c0_15 = arith.constant 0 : index
    %c0_16 = arith.constant 0 : index
    %c0_17 = arith.constant 0 : index
    %39 = vector.load %arg6[%c0_15, %c0_16, %c0_17] : memref<1x8x128xf32, #tpu.memory_space<vmem>>, vector<1x8x128xf32>
    %40 = vector.shape_cast %39 : vector<1x8x128xf32> to vector<8x128xf32>
    %cst_18 = arith.constant dense<0.000000e+00> : vector<8x128xf32>
    %41 = tpu.matmul %37, %38, %cst_18 {dimension_numbers = #tpu.dot_dimension_numbers<[1], [0], [0], [1], [0, 0, 1, 1], [], []>} : vector<8x128xf32>, vector<128x128xf32>, vector<8x128xf32> -> vector<8x128xf32>
    %42 = arith.addf %40, %41 : vector<8x128xf32>
    %c0_19 = arith.constant 0 : index
    %c0_20 = arith.constant 0 : index
    %c0_21 = arith.constant 0 : index
    %43 = vector.load %arg6[%c0_19, %c0_20, %c0_21] : memref<1x8x128xf32, #tpu.memory_space<vmem>>, vector<1x8x128xf32>
    %44 = vector.shape_cast %43 : vector<1x8x128xf32> to vector<8x128xf32>
    %45 = vector.shape_cast %42 : vector<8x128xf32> to vector<1x8x128xf32>
    tpu.vector_store %arg6[%c0_19, %c0_20, %c0_21], %45 {strides = array<i32>} : memref<1x8x128xf32, #tpu.memory_space<vmem>>, vector<1x8x128xf32>,
    return
  }
  func.func @transform_0(%arg0: i32, %arg1: i32) -> (i32, i32) {
    %c0_i32 = arith.constant 0 : i32
    %c0_i32_0 = arith.constant 0 : i32
    %c0_i32_1 = arith.constant 0 : i32
    return %c0_i32, %c0_i32_0 : i32, i32
  }
  func.func @transform_1(%arg0: i32, %arg1: i32) -> (i32, i32) {
    %c2_i32 = arith.constant 2 : i32
    %0 = arith.muli %arg0, %c2_i32 : i32
    %1 = arith.addi %0, %arg1 : i32
    %c0_i32 = arith.constant 0 : i32
    %c0_i32_0 = arith.constant 0 : i32
    return %c0_i32, %1 : i32, i32
  }
  func.func @transform_2(%arg0: i32, %arg1: i32) -> (i32, i32, i32) {
    %c0_i32 = arith.constant 0 : i32
    %c0_i32_0 = arith.constant 0 : i32
    %c0_i32_1 = arith.constant 0 : i32
    %c0_i32_2 = arith.constant 0 : i32
    return %c0_i32, %c0_i32_0, %c0_i32_1 : i32, i32, i32
  }
  func.func @transform_3(%arg0: i32, %arg1: i32) -> (i32, i32) {
    %c2_i32 = arith.constant 2 : i32
    %0 = arith.muli %arg0, %c2_i32 : i32
    %1 = arith.addi %0, %arg1 : i32
    %c0_i32 = arith.constant 0 : i32
    %c0_i32_0 = arith.constant 0 : i32
    return %1, %c0_i32 : i32, i32
  }
  func.func @transform_4(%arg0: i32, %arg1: i32) -> (i32, i32, i32) {
    %c0_i32 = arith.constant 0 : i32
    %c0_i32_0 = arith.constant 0 : i32
    %c0_i32_1 = arith.constant 0 : i32
    return %arg0, %c0_i32, %c0_i32_0 : i32, i32, i32
  }
}

</mosaic_0001>

<bundles_post_ra>
// kernel: _projector_impl.1
= control target key start
LH: loop header
LB: loop body
LE: loop exit
PB: predicated region body
PF: predicated region fallthrough
CT: control target
= control target key end

     0   :  { %9 = vsyncpa [#allocation3], 0  ;;  %s1295_s0 = inlined_call_operand.vmem [shape: f32[8,128], index: 0, kind: input, shape index: {}]   ;;  %s1296_s1 = inlined_call_operand.hbm [shape: f32[128,256], index: 1, kind: input, shape index: {}]   ;;  %s1297_s2 = inlined_call_operand.vmem [shape: f32[2,2,128], index: 2, kind: input, shape index: {}]   ;;  %s1298_s3 = inlined_call_operand.hbm [shape: f32[256,128], index: 3, kind: input, shape index: {}]   ;;  %s1299_s4 = inlined_call_operand.hbm [shape: f32[1,8,128], index: 4, kind: output, shape index: {}]  }
   0x1   :  { %11 = vsyncpa [#allocation3 + $0x1], 0 }
   0x2   :  { %12 = vsyncpa [#allocation6], 0 }
   0x3   :  { %14 = vsyncpa [#allocation6 + $0x1], 0 }
   0x4   :  { %15 = vsyncpa [#allocation4], 0  ;;  %s1028_s15 = smov 0   ;;  %s1030_s16 = smov 0  }
   0x5   :  { %s1032_s17 = smov 0   ;;  %s1034_s18 = smov 0  }
   0x6   :  { %s1036_s19 = smov 0   ;;  %s1038_s20 = smov 0  }
   0x7 LB: > { %s601_s21 = sadd.s32 4294967295, %s991_s20   ;;  %s30_s22 = sadd.s32 1, %s987_s19  ;;  %s991_s20 = sphi %s1038_s20, %s21_s20   ;;  %s987_s19 = sphi %s1036_s19, %s1312_s19   ;;  %s983_s18 = sphi %s1034_s18, %s1311_s18   ;;  %s979_s17 = sphi %s1032_s17, %s1310_s17   ;;  %s975_s16 = sphi %s1030_s16, %s1309_s16   ;;  %s971_s15 = sphi %s1028_s15, %s1308_s15  }
   0x8   : > { %p31_p0 = scmp.ge.s32.totalorder %s30_s22, 2  ;;  %s65_s23 = sadd.s32 1, %s979_s17 }
   0x9   : > { %p72_p1 = scmp.ne.s32.totalorder %s979_s17, %s975_s16  ;;  %p73_p2 = scmp.eq.s32.totalorder %s991_s20, 0 }
   0xa   : > { %s1314_s22 = smov (%p31_p0, %s30_s22), 0  ;;  %p78_p4 = scmp.ne.s32.totalorder %s975_s16, %s971_s15 }
   0xb   : > { %p1064_p3 = por %p73_p2, %p72_p1  ;;  %s62_s25 = ssub.s32 %s987_s19, %s1314_s22 }
   0xc   : > { %p79_p5 = scmp.eq.s32.totalorder %s601_s21, 0  ;;  %p63_p6 = scmp.eq.s32.totalorder %s62_s25, 0 }
   0xd   : > { %p786_p8 = scmp.lt.s32.totalorder %s991_s20, 2  ;;  %s1082_s28 = sand.u32 1, %s979_s17  }
   0xe   : > { %p1073_p7 = por %p79_p5, %p78_p4  ;;  %s605_s29 = sshll.u32 %s987_s19, 7 }
   0xf   : > { %s1079_s27 = scalar_select %p63_p6, %s979_s17, %s65_s23  }
  0x10   : > { %s1302_s26 = scalar_select %p1073_p7, 1, 0 }
  0x11   : > { %s604_s30 = sshll.u32 %s1082_s28, 7  ;;  %s1089_s7 = scalar_lea.hbm %s1296_s1, %s605_s29 }
  0x12   : > { %s189_s8 = scalar_lea.vmem [#allocation2], %s604_s30  ;;  %p1095_p9 = pnand %p786_p8, %p1064_p3 }
  0x13   : > { %s197_s9 = sshll.u32 %s189_s8, 4  ;;  %s186_s11 = scalar_lea.sflag [#allocation3], %s1082_s28  ;;  %s1099_s9 = int_to_ptr.vmem [resolvable:$true] %s197_s9 }
  0x14   : > { %s847_s12 = scalar_lea.hbm %s1089_s7, 2048  ;;  %p849_p12 = pneg %p1095_p9 }
  0x15   : > { %p848_p11 = scmp.ne.s32.totalorder %s1089_s7, %s847_s12  ;;  %s852_s15 = scalar_lea.hbm %s1296_s1, 4096 }
  0x16   : > { %p853_p1 = scmp.lt.u32.totalorder %s1089_s7, %s1296_s1  ;;  %p854_p2 = scmp.lt.u32.totalorder %s852_s15, %s847_s12 }
  0x17   : > { %p850_p13 = pnand %p849_p12, %p848_p11  ;;  %p856_p4 = scmp.lt.u32.totalorder %s847_s12, %s1089_s7 }
  0x18   : > { %p855_p3 = por %p854_p2, %p853_p1 }
  0x19   : > { %p851_p0 = pneg %p850_p13 }
  0x1a   : > { %p857_p5 = por %p856_p4, %p855_p3 }
  0x1c   : > { %p858_p6 = pnand %p857_p5, %p851_p0 }
  0x1e   : > { %861 = shalt.err (!%p858_p6)
}
  0x1f   : > { %s862_s25 = scalar_lea.vmem %s1099_s9, 2048  ;;  %s993_s29 = smov [#allocation2]  }
  0x20   : > { %p863_p8 = scmp.ne.s32.totalorder %s1099_s9, %s862_s25  ;;  %s867_s5 = sshll.u32 %s993_s29, 4  ;;  %s868_s5 = int_to_ptr.vmem [resolvable:$false] %s867_s5 }
  0x21   : > { %s869_s6 = scalar_lea.vmem %s868_s5, 4096  ;;  %p870_p10 = scmp.lt.s32.totalorder %s1099_s9, %s868_s5 }
  0x22   : > { %p865_p11 = pnand %p863_p8, %p849_p12  ;;  %p871_p1 = scmp.lt.s32.totalorder %s869_s6, %s862_s25 }
  0x24   : > { %p866_p13 = pneg %p865_p11  ;;  %p872_p2 = por %p871_p1, %p870_p10 }
  0x26   : > { %p873_p3 = pnand %p872_p2, %p866_p13 }
  0x28   : > { %876 = shalt.err (!%p873_p3)
}
  0x29   : > { %s994_s8 = smov 256   ;;  %s995_s12 = smov 128  }
  0x2a   : > { %s996_s13 = smov 8   ;;  %p228_p10 = scmp.lt.s32.totalorder %s991_s20, 3 }
  0x2b   : > { %782 = dma.hbm_to_vmem [thread:$0]  (!%p1095_p9), %s1089_s7, 2048, %s1099_s9, %s186_s11, %s994_s8, %s995_s12, %s996_s13  }
  0x2c   : > { %s618_s14 = sshll.u32 %s987_s19, 11  ;;  %p1304_p0 = scmp.ge.s32.totalorder %s991_s20, 1 }
  0x2d   : > { %s1143_s25 = scalar_lea.hbm %s1298_s3, %s618_s14  ;;  %s211_s29 = scalar_lea.vmem [#allocation5], %s604_s30 }
  0x2e   : > { %p1136_p4 = pnand %p1304_p0, %p228_p10  ;;  %s220_s5 = sshll.u32 %s211_s29, 4  ;;  %s1147_s5 = int_to_ptr.vmem [resolvable:$true] %s220_s5 }
  0x2f   : > { %s208_s7 = scalar_lea.sflag [#allocation6], %s1082_s28  ;;  %s877_s9 = scalar_lea.hbm %s1143_s25, 2048 }
  0x30   : > { %p878_p5 = scmp.ne.s32.totalorder %s1143_s25, %s877_s9  ;;  %s882_s8 = scalar_lea.hbm %s1298_s3, 4096 }
  0x31   : > { %p883_p11 = scmp.lt.u32.totalorder %s1143_s25, %s1298_s3  ;;  %p884_p13 = scmp.lt.u32.totalorder %s882_s8, %s877_s9 }
  0x32   : > { %p880_p6 = pnand %p878_p5, %p849_p12  ;;  %p886_p2 = scmp.lt.u32.totalorder %s877_s9, %s1143_s25 }
  0x33   : > { %p885_p1 = por %p884_p13, %p883_p11 }
  0x34   : > { %p881_p8 = pneg %p880_p6 }
  0x35   : > { %p887_p3 = por %p886_p2, %p885_p1 }
  0x37   : > { %p888_p10 = pnand %p887_p3, %p881_p8 }
  0x39   : > { %891 = shalt.err (!%p888_p10)
}
  0x3a   : > { %s892_s30 = scalar_lea.vmem %s1147_s5, 2048  ;;  %s997_s24 = smov [#allocation5]  }
  0x3b   : > { %p893_p0 = scmp.ne.s32.totalorder %s1147_s5, %s892_s30  ;;  %s897_s29 = sshll.u32 %s997_s24, 4  ;;  %s898_s29 = int_to_ptr.vmem [resolvable:$false] %s897_s29 }
  0x3c   : > { %s899_s11 = scalar_lea.vmem %s898_s29, 4096  ;;  %p900_p7 = scmp.lt.s32.totalorder %s1147_s5, %s898_s29 }
  0x3d   : > { %p895_p5 = pnand %p893_p0, %p849_p12  ;;  %p901_p11 = scmp.lt.s32.totalorder %s899_s11, %s892_s30 }
  0x3f   : > { %p896_p6 = pneg %p895_p5  ;;  %p902_p13 = por %p901_p11, %p900_p7 }
  0x41   : > { %p903_p1 = pnand %p902_p13, %p896_p6 }
  0x43   : > { %906 = shalt.err (!%p903_p1)
}
  0x44   : > { %785 = dma.hbm_to_vmem [thread:$0]  (!%p1095_p9), %s1143_s25, 2048, %s1147_s5, %s208_s7, %s995_s12, %s995_s12, %s996_s13  }
  0x45   : > { %232 = sbr.rel (%p1136_p4) target bundleno = 610 (0x262), region = 36  ;;  %s234_s9 = sand.u32 (!%p1136_p4), 1, %s975_s16  }
  0x46   : > { %s610_s6 = sshll.u32 (!%p1136_p4), %s234_s9, 7  ;;  %s235_s8 = scalar_lea.sflag (!%p1136_p4), [#allocation3], %s234_s9 }
  0x47   : > { %s1181_s14 = scalar_lea.vmem (!%p1136_p4), [#allocation2], %s610_s6  ;;  %p1306_p7 = scmp.ne.s32.totalorder (!%p1136_p4), %s1302_s26, 0 }
  0x4c   : > { %958 = dma.done.wait (%p1306_p7), %s235_s8, 2048  }
  0x4d   : > { %960 = vsyncadd (%p1306_p7), %s235_s8, 4294965248  ;;  %s244_s28 = scalar_lea.sflag [#allocation6], %s234_s9  ;;  %s1187_s10 = scalar_lea.vmem [#allocation5], %s610_s6 }
  0x4e   : > { %962 = dma.done.wait (%p1306_p7), %s244_s28, 2048  }
  0x4f   : > { %964 = vsyncadd (%p1306_p7), %s244_s28, 4294965248  ;;  %p612_p9 = scmp.ne.s32.totalorder %s983_s18, 0 }
  0x50   : > { %v998_v0 = vmov (!%p612_p9), 0.0  }
  0x51   : > { %280 = sbr.rel (%p612_p9) target bundleno = 88 (0x58), region = 48  ;;  %281 = vst [vmem:[#allocation7] sm:$0xff] (!%p612_p9), %v998_v0 }
  0x58 PF: > { %v283_v1 = vld [vmem:[%s1181_s14] sm:$0xff]  ;;  %v284_v2 = vld [vmem:[%s1181_s14 + $0x8] sm:$0xff]  ;;  %v285_v3 = vld [vmem:[%s1181_s14 + $0x10] sm:$0xff]  ;;  %v999_v4 = vmov 0.0|0.0   ;;  %vm1000_vm0 = vmmov 0   ;;  %v1001_v7 = vmov 0.0  }
  0x59   : > { %723 = vmatprep.subr.bf16.mxu0 %v999_v4  ;;  %v724_v5 = vpack.c.bf16 %v284_v2, %v283_v1  ;;  %v286_v6 = vld [vmem:[%s1181_s14 + $0x18] sm:$0xff]  ;;  %685 = vmatprep.mubr.msk.f32.mxu0 %vm1000_vm0, %v1001_v7  ;;  %v287_v9 = vld [vmem:[%s1181_s14 + $0x20] sm:$0xff]  ;;  %v288_v10 = vld [vmem:[%s1181_s14 + $0x28] sm:$0xff]  ;;  %s613_s13 = sshll.u32 %s983_s18, 1  ;;  %s1002_s18 = smov [#allocation7]  }
  0x5a   : > { %747 = vmatprep.subr.bf16.mxu1 %v999_v4  ;;  %720 = vmatprep.mubr.msk.f32.mxu1 %vm1000_vm0, %v1001_v7  ;;  %v727_v8 = vpack.c.bf16 %v286_v6, %v285_v3  ;;  %v730_v11 = vpack.c.bf16 %v288_v10, %v287_v9  ;;  %v289_v12 = vld [vmem:[%s1181_s14 + $0x30] sm:$0xff]  ;;  %v290_v13 = vld [vmem:[%s1181_s14 + $0x38] sm:$0xff]  ;;  %v291_v15 = vld [vmem:[%s1181_s14 + $0x40] sm:$0xff]  ;;  %v401_v10 = vlaneseq  ;;  %s393_s5 = scalar_lea.vmem %s1297_s2, %s613_s13  ;;  %s509_s7 = sshll.u32 %s1002_s18, 4  ;;  %s510_s7 = int_to_ptr.vmem [resolvable:$true] %s509_s7 }
  0x5b   : > { %725 = vmatpush3.bf16.msra.mxu0 %v724_v5  ;;  %v733_v14 = vpack.c.bf16 %v290_v13, %v289_v12  ;;  %v292_v16 = vld [vmem:[%s1181_s14 + $0x48] sm:$0xff]  ;;  %v293_v18 = vld [vmem:[%s1181_s14 + $0x50] sm:$0xff]  ;;  %v294_v19 = vld [vmem:[%s1181_s14 + $0x58] sm:$0xff]  ;;  %p1251_p12 = scmp.eq.s32.totalorder %s601_s21, 1  ;;  %s907_s30 = scalar_lea.vmem %s510_s7, 128 }
  0x5c   : > { %726 = vmatprep.subr.bf16.mxu0 %v999_v4  ;;  %v736_v17 = vpack.c.bf16 %v292_v16, %v291_v15  ;;  %v739_v20 = vpack.c.bf16 %v294_v19, %v293_v18  ;;  %v295_v21 = vld [vmem:[%s1181_s14 + $0x60] sm:$0xff]  ;;  %v296_v22 = vld [vmem:[%s1181_s14 + $0x68] sm:$0xff]  ;;  %v297_v24 = vld [vmem:[%s1181_s14 + $0x70] sm:$0xff]  ;;  %p908_p4 = scmp.ne.s32.totalorder %s510_s7, %s907_s30  ;;  %p914_p3 = scmp.lt.s32.totalorder %s510_s7, %s510_s7 }
  0x5d   : > { %v742_v23 = vpack.c.bf16 %v296_v22, %v295_v21  ;;  %v298_v25 = vld [vmem:[%s1181_s14 + $0x78] sm:$0xff]  ;;  %v282_v27 = vld [vmem:[%s1295_s0] sm:$0xff]  ;;  %v412_v29 = vld [vmem:[%s1187_s10 + $0x8] sm:$0xff]  ;;  %p915_p10 = scmp.lt.s32.totalorder %s907_s30, %s907_s30 }
  0x5e   : > { %v745_v26 = vpack.c.bf16 %v298_v25, %v297_v24  ;;  %v411_v28 = vld [vmem:[%s1187_s10] sm:$0xff]  ;;  %v413_v31 = vld [vmem:[%s1187_s10 + $0x10] sm:$0xff]  ;;  %v414_v32 = vld [vmem:[%s1187_s10 + $0x18] sm:$0xff]  ;;  %p909_p8 = pnand %p908_p4, %p1251_p12 }
  0x5f   : > { %728 = vmatpush3.bf16.msra.mxu0 %v727_v8  ;;  %v748_v30 = vpack.c.bf16 %v412_v29, %v411_v28  ;;  %v751_v33 = vpack.c.bf16 %v414_v32, %v413_v31  ;;  %v415_v34 = vld [vmem:[%s1187_s10 + $0x20] sm:$0xff]  ;;  %v416_v35 = vld [vmem:[%s1187_s10 + $0x28] sm:$0xff]  ;;  %v417_v37 = vld [vmem:[%s1187_s10 + $0x30] sm:$0xff]  ;;  %p916_p0 = por %p915_p10, %p914_p3 }
  0x60   : > { %729 = vmatprep.subr.bf16.mxu0 %v999_v4  ;;  %v754_v36 = vpack.c.bf16 %v416_v35, %v415_v34  ;;  %v418_v38 = vld [vmem:[%s1187_s10 + $0x38] sm:$0xff]  ;;  %v419_v40 = vld [vmem:[%s1187_s10 + $0x40] sm:$0xff]  ;;  %v420_v41 = vld [vmem:[%s1187_s10 + $0x48] sm:$0xff]  ;;  %p910_p2 = pneg %p909_p8 }
  0x61   : > { %749 = vmatpush3.bf16.msra.mxu1 %v748_v30  ;;  %v757_v39 = vpack.c.bf16 %v418_v38, %v417_v37  ;;  %v760_v42 = vpack.c.bf16 %v420_v41, %v419_v40  ;;  %v421_v43 = vld [vmem:[%s1187_s10 + $0x50] sm:$0xff]  ;;  %v422_v44 = vld [vmem:[%s1187_s10 + $0x58] sm:$0xff]  ;;  %v423_v46 = vld [vmem:[%s1187_s10 + $0x60] sm:$0xff] }
  0x62   : > { %750 = vmatprep.subr.bf16.mxu1 %v999_v4  ;;  %v763_v45 = vpack.c.bf16 %v422_v44, %v421_v43  ;;  %v424_v47 = vld [vmem:[%s1187_s10 + $0x68] sm:$0xff]  ;;  %v425_v49 = vld [vmem:[%s1187_s10 + $0x70] sm:$0xff]  ;;  %v426_v50 = vld [vmem:[%s1187_s10 + $0x78] sm:$0xff]  ;;  %p917_p5 = pnand %p916_p0, %p910_p2 }
  0x63   : > { %731 = vmatpush3.bf16.msra.mxu0 %v730_v11  ;;  %v766_v48 = vpack.c.bf16 %v424_v47, %v423_v46  ;;  %v769_v51 = vpack.c.bf16 %v426_v50, %v425_v49  ;;  %v402_v11 = vshrl.u32 %v401_v10, 7  ;;  %v394_v12 = vld [vmem:[%s393_s5] sm:$0x3] }
  0x64   : > { %732 = vmatprep.subr.bf16.mxu0 %v999_v4  ;;  %v427_v24 = vld [vmem:[#allocation7] sm:$0xff] }
  0x65   : > { %752 = vmatpush3.bf16.msra.mxu1 %v751_v33  ;;  %v403_v15 = vsub.s32 0, %v402_v11  ;;  %v408_v19 = vsub.s32 1, %v402_v11 }
  0x66   : > { %753 = vmatprep.subr.bf16.mxu1 %v999_v4 }
  0x67   : > { %734 = vmatpush3.bf16.msra.mxu0 %v733_v14 }
  0x68   : > { %735 = vmatprep.subr.bf16.mxu0 %v999_v4 }
  0x69   : > { %755 = vmatpush3.bf16.msra.mxu1 %v754_v36 }
  0x6a   : > { %756 = vmatprep.subr.bf16.mxu1 %v999_v4 }
  0x6b   : > { %737 = vmatpush3.bf16.msra.mxu0 %v736_v17 }
  0x6c   : > { %738 = vmatprep.subr.bf16.mxu0 %v999_v4 }
  0x6d   : > { %758 = vmatpush3.bf16.msra.mxu1 %v757_v39 }
  0x6e   : > { %759 = vmatprep.subr.bf16.mxu1 %v999_v4 }
  0x6f   : > { %740 = vmatpush3.bf16.msra.mxu0 %v739_v20 }
  0x70   : > { %741 = vmatprep.subr.bf16.mxu0 %v999_v4 }
  0x71   : > { %761 = vmatpush3.bf16.msra.mxu1 %v760_v42 }
  0x72   : > { %762 = vmatprep.subr.bf16.mxu1 %v999_v4 }
  0x73   : > { %743 = vmatpush3.bf16.msra.mxu0 %v742_v23 }
  0x74   : > { %744 = vmatprep.subr.bf16.mxu0 %v999_v4 }
  0x75   : > { %764 = vmatpush3.bf16.msra.mxu1 %v763_v45 }
  0x76   : > { %765 = vmatprep.subr.bf16.mxu1 %v999_v4 }
  0x77   : > { %746 = vmatpush3.bf16.msra.mxu0 %v745_v26 }
  0x79   : > { %767 = vmatpush3.bf16.msra.mxu1 %v766_v48 }
  0x7a   : > { %686 = vmatmul.mubr.f32.vlgmr.msra.gmra.mrb[0].mxu0 %v282_v27  ;;  %768 = vmatprep.subr.bf16.mxu1 %v999_v4 }
  0x7d   : > { %770 = vmatpush3.bf16.msra.mxu1 %v769_v51 }
 0x14d   : > { %v365_v52 = vpop.f32.mrb[0].mxu0 }
 0x14e   : > { %v369_v53 = vmax.f32 %v365_v52, 0.0  ;;  %v687_v54 = vpop.f32.mrb[1].mxu0 }
 0x150   : > { %v370_v55 = vrot.slane %v369_v53, 4  ;;  %v376_v56 = vmul.f32 %v369_v53, %v369_v53 }
 0x152   : > { %v371_v57 = vadd.f32 %v370_v55, %v369_v53  ;;  %v377_v58 = vrot.slane %v376_v56, 4 }
 0x154   : > { %v372_v59 = vrot.slane %v371_v57, 2  ;;  %v378_v60 = vadd.f32 %v377_v58, %v376_v56 }
 0x156   : > { %v373_v61 = vadd.f32 %v372_v59, %v371_v57  ;;  %v379_v62 = vrot.slane %v378_v60, 2 }
 0x158   : > { %v374_v63 = vrot.slane %v373_v61, 1  ;;  %v380_v0 = vadd.f32 %v379_v62, %v378_v60 }
 0x15a   : > { %v375_v1 = vadd.f32 %v374_v63, %v373_v61  ;;  %v381_v2 = vrot.slane %v380_v0, 1 }
 0x15c   : > { %v382_v3 = vadd.f32 %v381_v2, %v380_v0  ;;  %v383_v5 = vmul.f32 0.125, %v375_v1 }
 0x15e   : > { %v384_v4 = vmul.f32 0.125, %v382_v3  ;;  %v385_v6 = vmul.f32 %v383_v5, %v383_v5 }
 0x160   : > { %v386_v7 = vsub.f32 %v384_v4, %v385_v6 }
 0x162   : > { %v387_v8 = vmax.f32 %v386_v7, 0.0 }
 0x164   : > { %v388_v9 = vadd.f32 1e-05, %v387_v8 }
 0x166   : > { %845 = vrsqrt.f32 %v388_v9 }
 0x170   : > { %v846_v13 = vpop.eup %845 }
 0x171   : > { %v395_v14 = vmul.f32 %v846_v13, %v394_v12 }
 0x173   : > { %v396_v16 = vmul.f32 %v395_v14, %v383_v5  ;;  %v404_v18 = vrot.slane %v395_v14, %v403_v15 }
 0x175   : > { %v398_v17 = vrot.slane %v396_v16, 7  ;;  %v405_v21 = vmul.f32 %v404_v18, %v369_v53 }
 0x177   : > { %v400_v20 = vsub.f32 %v394_v12, %v398_v17 }
 0x179   : > { %v409_v22 = vrot.slane %v400_v20, %v408_v19 }
 0x17b   : > { %v410_v23 = vadd.f32 %v409_v22, %v405_v21 }
 0x17d   : > { %721 = vmatmul.mubr.f32.vlgmr.msra.gmra.mrb[0].mxu1 %v410_v23 }
 0x250   : > { %v494_v25 = vpop.f32.mrb[0].mxu1 }
 0x251   : > { %v498_v26 = vadd.f32 %v494_v25, %v427_v24  ;;  %v722_v27 = vpop.f32.mrb[1].mxu1 }
 0x253   : > { %499 = vst [vmem:[#allocation7] sm:$0xff] %v498_v26 }
 0x254   : > { %920 = shalt.err (!%p917_p5)
}
 0x255   : > { %s921_s29 = scalar_lea.hbm %s1299_s4, 128 }
 0x256   : > { %p922_p6 = scmp.ne.s32.totalorder %s1299_s4, %s921_s29  ;;  %p927_p1 = scmp.lt.u32.totalorder %s921_s29, %s1299_s4 }
 0x258   : > { %p923_p11 = pnand %p922_p6, %p1251_p12 }
 0x25a   : > { %p924_p13 = pneg %p923_p11 }
 0x25c   : > { %p929_p7 = pnand %p927_p1, %p924_p13 }
 0x25e   : > { %932 = shalt.err (!%p929_p7)
}
 0x25f   : > { %776 = dma.vmem_to_hbm [thread:$0]  (%p1251_p12), %s510_s7, 128, %s1299_s4, [#allocation4]  }
 0x260   : > { %966 = dma.done.wait (%p1251_p12), [#allocation4], 128  }
 0x261   : > { %968 = vsyncadd (%p1251_p12), [#allocation4], 4294967168 }
 0x262 PF: > { %s21_s20 = sadd.s32 1, %s991_s20   ;;  %s1308_s15 = smov %s975_s16 }
 0x263   : > { %p18_p9 = scmp.ge.s32.totalorder %s21_s20, 4   ;;  %s1309_s16 = smov %s979_s17 }
 0x264   : > { %s1310_s17 = smov %s1079_s27  ;;  %s1311_s18 = smov %s987_s19 }
 0x265   : > { %s1312_s19 = smov %s1314_s22  ;;  %20 = sbr.rel (!%p18_p9) target bundleno = 7 (0x7), region = 92 }
 0x26c   :  { %522 = vsyncpa [#allocation3], 1 }
 0x26d   :  { %524 = vsyncpa [#allocation3 + $0x1], 1 }
 0x26e   :  { %525 = vsyncpa [#allocation6], 1 }
 0x26f   :  { %527 = vsyncpa [#allocation6 + $0x1], 1 }
 0x270   :  { %528 = vsyncpa [#allocation4], 1 }
 0x271   :  { %530 = vsyncpa [#allocation4 + $0x1], 1 }

// kernel: _projector_impl.1
= control target key start
LH: loop header
LB: loop body
LE: loop exit
PB: predicated region body
PF: predicated region fallthrough
CT: control target
= control target key end

     0   :  { %9 = vsyncpa [#allocation3], 0  ;;  %s1295_s0 = inlined_call_operand.vmem [shape: f32[8,128], index: 0, kind: input, shape index: {}]   ;;  %s1296_s1 = inlined_call_operand.hbm [shape: f32[128,256], index: 1, kind: input, shape index: {}]   ;;  %s1297_s2 = inlined_call_operand.vmem [shape: f32[2,2,128], index: 2, kind: input, shape index: {}]   ;;  %s1298_s3 = inlined_call_operand.hbm [shape: f32[256,128], index: 3, kind: input, shape index: {}]   ;;  %s1299_s4 = inlined_call_operand.hbm [shape: f32[1,8,128], index: 4, kind: output, shape index: {}]  }
   0x1   :  { %11 = vsyncpa [#allocation3 + $0x1], 0 }
   0x2   :  { %12 = vsyncpa [#allocation6], 0 }
   0x3   :  { %14 = vsyncpa [#allocation6 + $0x1], 0 }
   0x4   :  { %15 = vsyncpa [#allocation4], 0  ;;  %s1028_s15 = smov 0   ;;  %s1030_s16 = smov 0  }
   0x5   :  { %s1032_s17 = smov 0   ;;  %s1034_s18 = smov 0  }
   0x6   :  { %s1036_s19 = smov 0   ;;  %s1038_s20 = smov 0  }
   0x7 LB: > { %s601_s21 = sadd.s32 4294967295, %s991_s20   ;;  %s30_s22 = sadd.s32 1, %s987_s19  ;;  %s991_s20 = sphi %s1038_s20, %s21_s20   ;;  %s987_s19 = sphi %s1036_s19, %s1312_s19   ;;  %s983_s18 = sphi %s1034_s18, %s1311_s18   ;;  %s979_s17 = sphi %s1032_s17, %s1310_s17   ;;  %s975_s16 = sphi %s1030_s16, %s1309_s16   ;;  %s971_s15 = sphi %s1028_s15, %s1308_s15  }
   0x8   : > { %p31_p0 = scmp.ge.s32.totalorder %s30_s22, 2  ;;  %s65_s23 = sadd.s32 1, %s979_s17 }
   0x9   : > { %p72_p1 = scmp.ne.s32.totalorder %s979_s17, %s975_s16  ;;  %p73_p2 = scmp.eq.s32.totalorder %s991_s20, 0 }
   0xa   : > { %s1314_s22 = smov (%p31_p0, %s30_s22), 0  ;;  %p78_p4 = scmp.ne.s32.totalorder %s975_s16, %s971_s15 }
   0xb   : > { %p1064_p3 = por %p73_p2, %p72_p1  ;;  %s62_s25 = ssub.s32 %s987_s19, %s1314_s22 }
   0xc   : > { %p79_p5 = scmp.eq.s32.totalorder %s601_s21, 0  ;;  %p63_p6 = scmp.eq.s32.totalorder %s62_s25, 0 }
   0xd   : > { %p786_p8 = scmp.lt.s32.totalorder %s991_s20, 2  ;;  %s1082_s28 = sand.u32 1, %s979_s17  }
   0xe   : > { %p1073_p7 = por %p79_p5, %p78_p4  ;;  %s605_s29 = sshll.u32 %s987_s19, 7 }
   0xf   : > { %s1079_s27 = scalar_select %p63_p6, %s979_s17, %s65_s23  }
  0x10   : > { %s1302_s26 = scalar_select %p1073_p7, 1, 0 }
  0x11   : > { %s604_s30 = sshll.u32 %s1082_s28, 7  ;;  %s1089_s7 = scalar_lea.hbm %s1296_s1, %s605_s29 }
  0x12   : > { %s189_s8 = scalar_lea.vmem [#allocation2], %s604_s30  ;;  %p1095_p9 = pnand %p786_p8, %p1064_p3 }
  0x13   : > { %s197_s9 = sshll.u32 %s189_s8, 4  ;;  %s186_s11 = scalar_lea.sflag [#allocation3], %s1082_s28  ;;  %s1099_s9 = int_to_ptr.vmem [resolvable:$true] %s197_s9 }
  0x14   : > { %s847_s12 = scalar_lea.hbm %s1089_s7, 2048  ;;  %p849_p12 = pneg %p1095_p9 }
  0x15   : > { %p848_p11 = scmp.ne.s32.totalorder %s1089_s7, %s847_s12  ;;  %s852_s15 = scalar_lea.hbm %s1296_s1, 4096 }
  0x16   : > { %p853_p1 = scmp.lt.u32.totalorder %s1089_s7, %s1296_s1  ;;  %p854_p2 = scmp.lt.u32.totalorder %s852_s15, %s847_s12 }
  0x17   : > { %p850_p13 = pnand %p849_p12, %p848_p11  ;;  %p856_p4 = scmp.lt.u32.totalorder %s847_s12, %s1089_s7 }
  0x18   : > { %p855_p3 = por %p854_p2, %p853_p1 }
  0x19   : > { %p851_p0 = pneg %p850_p13 }
  0x1a   : > { %p857_p5 = por %p856_p4, %p855_p3 }
  0x1c   : > { %p858_p6 = pnand %p857_p5, %p851_p0 }
  0x1e   : > { %861 = shalt.err (!%p858_p6)
}
  0x1f   : > { %s862_s25 = scalar_lea.vmem %s1099_s9, 2048  ;;  %s993_s29 = smov [#allocation2]  }
  0x20   : > { %p863_p8 = scmp.ne.s32.totalorder %s1099_s9, %s862_s25  ;;  %s867_s5 = sshll.u32 %s993_s29, 4  ;;  %s868_s5 = int_to_ptr.vmem [resolvable:$false] %s867_s5 }
  0x21   : > { %s869_s6 = scalar_lea.vmem %s868_s5, 4096  ;;  %p870_p10 = scmp.lt.s32.totalorder %s1099_s9, %s868_s5 }
  0x22   : > { %p865_p11 = pnand %p863_p8, %p849_p12  ;;  %p871_p1 = scmp.lt.s32.totalorder %s869_s6, %s862_s25 }
  0x24   : > { %p866_p13 = pneg %p865_p11  ;;  %p872_p2 = por %p871_p1, %p870_p10 }
  0x26   : > { %p873_p3 = pnand %p872_p2, %p866_p13 }
  0x28   : > { %876 = shalt.err (!%p873_p3)
}
  0x29   : > { %s994_s8 = smov 256   ;;  %s995_s12 = smov 128  }
  0x2a   : > { %s996_s13 = smov 8   ;;  %p228_p10 = scmp.lt.s32.totalorder %s991_s20, 3 }
  0x2b   : > { %782 = dma.hbm_to_vmem [thread:$0]  (!%p1095_p9), %s1089_s7, 2048, %s1099_s9, %s186_s11, %s994_s8, %s995_s12, %s996_s13  }
  0x2c   : > { %s618_s14 = sshll.u32 %s987_s19, 11  ;;  %p1304_p0 = scmp.ge.s32.totalorder %s991_s20, 1 }
  0x2d   : > { %s1143_s25 = scalar_lea.hbm %s1298_s3, %s618_s14  ;;  %s211_s29 = scalar_lea.vmem [#allocation5], %s604_s30 }
  0x2e   : > { %p1136_p4 = pnand %p1304_p0, %p228_p10  ;;  %s220_s5 = sshll.u32 %s211_s29, 4  ;;  %s1147_s5 = int_to_ptr.vmem [resolvable:$true] %s220_s5 }
  0x2f   : > { %s208_s7 = scalar_lea.sflag [#allocation6], %s1082_s28  ;;  %s877_s9 = scalar_lea.hbm %s1143_s25, 2048 }
  0x30   : > { %p878_p5 = scmp.ne.s32.totalorder %s1143_s25, %s877_s9  ;;  %s882_s8 = scalar_lea.hbm %s1298_s3, 4096 }
  0x31   : > { %p883_p11 = scmp.lt.u32.totalorder %s1143_s25, %s1298_s3  ;;  %p884_p13 = scmp.lt.u32.totalorder %s882_s8, %s877_s9 }
  0x32   : > { %p880_p6 = pnand %p878_p5, %p849_p12  ;;  %p886_p2 = scmp.lt.u32.totalorder %s877_s9, %s1143_s25 }
  0x33   : > { %p885_p1 = por %p884_p13, %p883_p11 }
  0x34   : > { %p881_p8 = pneg %p880_p6 }
  0x35   : > { %p887_p3 = por %p886_p2, %p885_p1 }
  0x37   : > { %p888_p10 = pnand %p887_p3, %p881_p8 }
  0x39   : > { %891 = shalt.err (!%p888_p10)
}
  0x3a   : > { %s892_s30 = scalar_lea.vmem %s1147_s5, 2048  ;;  %s997_s24 = smov [#allocation5]  }
  0x3b   : > { %p893_p0 = scmp.ne.s32.totalorder %s1147_s5, %s892_s30  ;;  %s897_s29 = sshll.u32 %s997_s24, 4  ;;  %s898_s29 = int_to_ptr.vmem [resolvable:$false] %s897_s29 }
  0x3c   : > { %s899_s11 = scalar_lea.vmem %s898_s29, 4096  ;;  %p900_p7 = scmp.lt.s32.totalorder %s1147_s5, %s898_s29 }
  0x3d   : > { %p895_p5 = pnand %p893_p0, %p849_p12  ;;  %p901_p11 = scmp.lt.s32.totalorder %s899_s11, %s892_s30 }
  0x3f   : > { %p896_p6 = pneg %p895_p5  ;;  %p902_p13 = por %p901_p11, %p900_p7 }
  0x41   : > { %p903_p1 = pnand %p902_p13, %p896_p6 }
  0x43   : > { %906 = shalt.err (!%p903_p1)
}
  0x44   : > { %785 = dma.hbm_to_vmem [thread:$0]  (!%p1095_p9), %s1143_s25, 2048, %s1147_s5, %s208_s7, %s995_s12, %s995_s12, %s996_s13  }
  0x45   : > { %232 = sbr.rel (%p1136_p4) target bundleno = 610 (0x262), region = 36  ;;  %s234_s9 = sand.u32 (!%p1136_p4), 1, %s975_s16  }
  0x46   : > { %s610_s6 = sshll.u32 (!%p1136_p4), %s234_s9, 7  ;;  %s235_s8 = scalar_lea.sflag (!%p1136_p4), [#allocation3], %s234_s9 }
  0x47   : > { %s1181_s14 = scalar_lea.vmem (!%p1136_p4), [#allocation2], %s610_s6  ;;  %p1306_p7 = scmp.ne.s32.totalorder (!%p1136_p4), %s1302_s26, 0 }
  0x4c   : > { %958 = dma.done.wait (%p1306_p7), %s235_s8, 2048  }
  0x4d   : > { %960 = vsyncadd (%p1306_p7), %s235_s8, 4294965248  ;;  %s244_s28 = scalar_lea.sflag [#allocation6], %s234_s9  ;;  %s1187_s10 = scalar_lea.vmem [#allocation5], %s610_s6 }
  0x4e   : > { %962 = dma.done.wait (%p1306_p7), %s244_s28, 2048  }
  0x4f   : > { %964 = vsyncadd (%p1306_p7), %s244_s28, 4294965248  ;;  %p612_p9 = scmp.ne.s32.totalorder %s983_s18, 0 }
  0x50   : > { %v998_v0 = vmov (!%p612_p9), 0.0  }
  0x51   : > { %280 = sbr.rel (%p612_p9) target bundleno = 88 (0x58), region = 48  ;;  %281 = vst [vmem:[#allocation7] sm:$0xff] (!%p612_p9), %v998_v0 }
  0x58 PF: > { %v283_v1 = vld [vmem:[%s1181_s14] sm:$0xff]  ;;  %v284_v2 = vld [vmem:[%s1181_s14 + $0x8] sm:$0xff]  ;;  %v285_v3 = vld [vmem:[%s1181_s14 + $0x10] sm:$0xff]  ;;  %v999_v4 = vmov 0.0|0.0   ;;  %vm1000_vm0 = vmmov 0   ;;  %v1001_v7 = vmov 0.0  }
  0x59   : > { %723 = vmatprep.subr.bf16.mxu0 %v999_v4  ;;  %v724_v5 = vpack.c.bf16 %v284_v2, %v283_v1  ;;  %v286_v6 = vld [vmem:[%s1181_s14 + $0x18] sm:$0xff]  ;;  %685 = vmatprep.mubr.msk.f32.mxu0 %vm1000_vm0, %v1001_v7  ;;  %v287_v9 = vld [vmem:[%s1181_s14 + $0x20] sm:$0xff]  ;;  %v288_v10 = vld [vmem:[%s1181_s14 + $0x28] sm:$0xff]  ;;  %s613_s13 = sshll.u32 %s983_s18, 1  ;;  %s1002_s18 = smov [#allocation7]  }
  0x5a   : > { %747 = vmatprep.subr.bf16.mxu1 %v999_v4  ;;  %720 = vmatprep.mubr.msk.f32.mxu1 %vm1000_vm0, %v1001_v7  ;;  %v727_v8 = vpack.c.bf16 %v286_v6, %v285_v3  ;;  %v730_v11 = vpack.c.bf16 %v288_v10, %v287_v9  ;;  %v289_v12 = vld [vmem:[%s1181_s14 + $0x30] sm:$0xff]  ;;  %v290_v13 = vld [vmem:[%s1181_s14 + $0x38] sm:$0xff]  ;;  %v291_v15 = vld [vmem:[%s1181_s14 + $0x40] sm:$0xff]  ;;  %v401_v10 = vlaneseq  ;;  %s393_s5 = scalar_lea.vmem %s1297_s2, %s613_s13  ;;  %s509_s7 = sshll.u32 %s1002_s18, 4  ;;  %s510_s7 = int_to_ptr.vmem [resolvable:$true] %s509_s7 }
  0x5b   : > { %725 = vmatpush3.bf16.msra.mxu0 %v724_v5  ;;  %v733_v14 = vpack.c.bf16 %v290_v13, %v289_v12  ;;  %v292_v16 = vld [vmem:[%s1181_s14 + $0x48] sm:$0xff]  ;;  %v293_v18 = vld [vmem:[%s1181_s14 + $0x50] sm:$0xff]  ;;  %v294_v19 = vld [vmem:[%s1181_s14 + $0x58] sm:$0xff]  ;;  %p1251_p12 = scmp.eq.s32.totalorder %s601_s21, 1  ;;  %s907_s30 = scalar_lea.vmem %s510_s7, 128 }
  0x5c   : > { %726 = vmatprep.subr.bf16.mxu0 %v999_v4  ;;  %v736_v17 = vpack.c.bf16 %v292_v16, %v291_v15  ;;  %v739_v20 = vpack.c.bf16 %v294_v19, %v293_v18  ;;  %v295_v21 = vld [vmem:[%s1181_s14 + $0x60] sm:$0xff]  ;;  %v296_v22 = vld [vmem:[%s1181_s14 + $0x68] sm:$0xff]  ;;  %v297_v24 = vld [vmem:[%s1181_s14 + $0x70] sm:$0xff]  ;;  %p908_p4 = scmp.ne.s32.totalorder %s510_s7, %s907_s30  ;;  %p914_p3 = scmp.lt.s32.totalorder %s510_s7, %s510_s7 }
  0x5d   : > { %v742_v23 = vpack.c.bf16 %v296_v22, %v295_v21  ;;  %v298_v25 = vld [vmem:[%s1181_s14 + $0x78] sm:$0xff]  ;;  %v282_v27 = vld [vmem:[%s1295_s0] sm:$0xff]  ;;  %v412_v29 = vld [vmem:[%s1187_s10 + $0x8] sm:$0xff]  ;;  %p915_p10 = scmp.lt.s32.totalorder %s907_s30, %s907_s30 }
  0x5e   : > { %v745_v26 = vpack.c.bf16 %v298_v25, %v297_v24  ;;  %v411_v28 = vld [vmem:[%s1187_s10] sm:$0xff]  ;;  %v413_v31 = vld [vmem:[%s1187_s10 + $0x10] sm:$0xff]  ;;  %v414_v32 = vld [vmem:[%s1187_s10 + $0x18] sm:$0xff]  ;;  %p909_p8 = pnand %p908_p4, %p1251_p12 }
  0x5f   : > { %728 = vmatpush3.bf16.msra.mxu0 %v727_v8  ;;  %v748_v30 = vpack.c.bf16 %v412_v29, %v411_v28  ;;  %v751_v33 = vpack.c.bf16 %v414_v32, %v413_v31  ;;  %v415_v34 = vld [vmem:[%s1187_s10 + $0x20] sm:$0xff]  ;;  %v416_v35 = vld [vmem:[%s1187_s10 + $0x28] sm:$0xff]  ;;  %v417_v37 = vld [vmem:[%s1187_s10 + $0x30] sm:$0xff]  ;;  %p916_p0 = por %p915_p10, %p914_p3 }
  0x60   : > { %729 = vmatprep.subr.bf16.mxu0 %v999_v4  ;;  %v754_v36 = vpack.c.bf16 %v416_v35, %v415_v34  ;;  %v418_v38 = vld [vmem:[%s1187_s10 + $0x38] sm:$0xff]  ;;  %v419_v40 = vld [vmem:[%s1187_s10 + $0x40] sm:$0xff]  ;;  %v420_v41 = vld [vmem:[%s1187_s10 + $0x48] sm:$0xff]  ;;  %p910_p2 = pneg %p909_p8 }
  0x61   : > { %749 = vmatpush3.bf16.msra.mxu1 %v748_v30  ;;  %v757_v39 = vpack.c.bf16 %v418_v38, %v417_v37  ;;  %v760_v42 = vpack.c.bf16 %v420_v41, %v419_v40  ;;  %v421_v43 = vld [vmem:[%s1187_s10 + $0x50] sm:$0xff]  ;;  %v422_v44 = vld [vmem:[%s1187_s10 + $0x58] sm:$0xff]  ;;  %v423_v46 = vld [vmem:[%s1187_s10 + $0x60] sm:$0xff] }
  0x62   : > { %750 = vmatprep.subr.bf16.mxu1 %v999_v4  ;;  %v763_v45 = vpack.c.bf16 %v422_v44, %v421_v43  ;;  %v424_v47 = vld [vmem:[%s1187_s10 + $0x68] sm:$0xff]  ;;  %v425_v49 = vld [vmem:[%s1187_s10 + $0x70] sm:$0xff]  ;;  %v426_v50 = vld [vmem:[%s1187_s10 + $0x78] sm:$0xff]  ;;  %p917_p5 = pnand %p916_p0, %p910_p2 }
  0x63   : > { %731 = vmatpush3.bf16.msra.mxu0 %v730_v11  ;;  %v766_v48 = vpack.c.bf16 %v424_v47, %v423_v46  ;;  %v769_v51 = vpack.c.bf16 %v426_v50, %v425_v49  ;;  %v402_v11 = vshrl.u32 %v401_v10, 7  ;;  %v394_v12 = vld [vmem:[%s393_s5] sm:$0x3] }
  0x64   : > { %732 = vmatprep.subr.bf16.mxu0 %v999_v4  ;;  %v427_v24 = vld [vmem:[#allocation7] sm:$0xff] }
  0x65   : > { %752 = vmatpush3.bf16.msra.mxu1 %v751_v33  ;;  %v403_v15 = vsub.s32 0, %v402_v11  ;;  %v408_v19 = vsub.s32 1, %v402_v11 }
  0x66   : > { %753 = vmatprep.subr.bf16.mxu1 %v999_v4 }
  0x67   : > { %734 = vmatpush3.bf16.msra.mxu0 %v733_v14 }
  0x68   : > { %735 = vmatprep.subr.bf16.mxu0 %v999_v4 }
  0x69   : > { %755 = vmatpush3.bf16.msra.mxu1 %v754_v36 }
  0x6a   : > { %756 = vmatprep.subr.bf16.mxu1 %v999_v4 }
  0x6b   : > { %737 = vmatpush3.bf16.msra.mxu0 %v736_v17 }
  0x6c   : > { %738 = vmatprep.subr.bf16.mxu0 %v999_v4 }
  0x6d   : > { %758 = vmatpush3.bf16.msra.mxu1 %v757_v39 }
  0x6e   : > { %759 = vmatprep.subr.bf16.mxu1 %v999_v4 }
  0x6f   : > { %740 = vmatpush3.bf16.msra.mxu0 %v739_v20 }
  0x70   : > { %741 = vmatprep.subr.bf16.mxu0 %v999_v4 }
  0x71   : > { %761 = vmatpush3.bf16.msra.mxu1 %v760_v42 }
  0x72   : > { %762 = vmatprep.subr.bf16.mxu1 %v999_v4 }
  0x73   : > { %743 = vmatpush3.bf16.msra.mxu0 %v742_v23 }
  0x74   : > { %744 = vmatprep.subr.bf16.mxu0 %v999_v4 }
  0x75   : > { %764 = vmatpush3.bf16.msra.mxu1 %v763_v45 }
  0x76   : > { %765 = vmatprep.subr.bf16.mxu1 %v999_v4 }
  0x77   : > { %746 = vmatpush3.bf16.msra.mxu0 %v745_v26 }
  0x79   : > { %767 = vmatpush3.bf16.msra.mxu1 %v766_v48 }
  0x7a   : > { %686 = vmatmul.mubr.f32.vlgmr.msra.gmra.mrb[0].mxu0 %v282_v27  ;;  %768 = vmatprep.subr.bf16.mxu1 %v999_v4 }
  0x7d   : > { %770 = vmatpush3.bf16.msra.mxu1 %v769_v51 }
 0x14d   : > { %v365_v52 = vpop.f32.mrb[0].mxu0 }
 0x14e   : > { %v369_v53 = vmax.f32 %v365_v52, 0.0  ;;  %v687_v54 = vpop.f32.mrb[1].mxu0 }
 0x150   : > { %v370_v55 = vrot.slane %v369_v53, 4  ;;  %v376_v56 = vmul.f32 %v369_v53, %v369_v53 }
 0x152   : > { %v371_v57 = vadd.f32 %v370_v55, %v369_v53  ;;  %v377_v58 = vrot.slane %v376_v56, 4 }
 0x154   : > { %v372_v59 = vrot.slane %v371_v57, 2  ;;  %v378_v60 = vadd.f32 %v377_v58, %v376_v56 }
 0x156   : > { %v373_v61 = vadd.f32 %v372_v59, %v371_v57  ;;  %v379_v62 = vrot.slane %v378_v60, 2 }
 0x158   : > { %v374_v63 = vrot.slane %v373_v61, 1  ;;  %v380_v0 = vadd.f32 %v379_v62, %v378_v60 }
 0x15a   : > { %v375_v1 = vadd.f32 %v374_v63, %v373_v61  ;;  %v381_v2 = vrot.slane %v380_v0, 1 }
 0x15c   : > { %v382_v3 = vadd.f32 %v381_v2, %v380_v0  ;;  %v383_v5 = vmul.f32 0.125, %v375_v1 }
 0x15e   : > { %v384_v4 = vmul.f32 0.125, %v382_v3  ;;  %v385_v6 = vmul.f32 %v383_v5, %v383_v5 }
 0x160   : > { %v386_v7 = vsub.f32 %v384_v4, %v385_v6 }
 0x162   : > { %v387_v8 = vmax.f32 %v386_v7, 0.0 }
 0x164   : > { %v388_v9 = vadd.f32 1e-05, %v387_v8 }
 0x166   : > { %845 = vrsqrt.f32 %v388_v9 }
 0x170   : > { %v846_v13 = vpop.eup %845 }
 0x171   : > { %v395_v14 = vmul.f32 %v846_v13, %v394_v12 }
 0x173   : > { %v396_v16 = vmul.f32 %v395_v14, %v383_v5  ;;  %v404_v18 = vrot.slane %v395_v14, %v403_v15 }
 0x175   : > { %v398_v17 = vrot.slane %v396_v16, 7  ;;  %v405_v21 = vmul.f32 %v404_v18, %v369_v53 }
 0x177   : > { %v400_v20 = vsub.f32 %v394_v12, %v398_v17 }
 0x179   : > { %v409_v22 = vrot.slane %v400_v20, %v408_v19 }
 0x17b   : > { %v410_v23 = vadd.f32 %v409_v22, %v405_v21 }
 0x17d   : > { %721 = vmatmul.mubr.f32.vlgmr.msra.gmra.mrb[0].mxu1 %v410_v23 }
 0x250   : > { %v494_v25 = vpop.f32.mrb[0].mxu1 }
 0x251   : > { %v498_v26 = vadd.f32 %v494_v25, %v427_v24  ;;  %v722_v27 = vpop.f32.mrb[1].mxu1 }
 0x253   : > { %499 = vst [vmem:[#allocation7] sm:$0xff] %v498_v26 }
 0x254   : > { %920 = shalt.err (!%p917_p5)
}
 0x255   : > { %s921_s29 = scalar_lea.hbm %s1299_s4, 128 }
 0x256   : > { %p922_p6 = scmp.ne.s32.totalorder %s1299_s4, %s921_s29  ;;  %p927_p1 = scmp.lt.u32.totalorder %s921_s29, %s1299_s4 }
 0x258   : > { %p923_p11 = pnand %p922_p6, %p1251_p12 }
 0x25a   : > { %p924_p13 = pneg %p923_p11 }
 0x25c   : > { %p929_p7 = pnand %p927_p1, %p924_p13 }
 0x25e   : > { %932 = shalt.err (!%p929_p7)
}
 0x25f   : > { %776 = dma.vmem_to_hbm [thread:$0]  (%p1251_p12), %s510_s7, 128, %s1299_s4, [#allocation4]  }
 0x260   : > { %966 = dma.done.wait (%p1251_p12), [#allocation4], 128  }
 0x261   : > { %968 = vsyncadd (%p1251_p12), [#allocation4], 4294967168 }
 0x262 PF: > { %s21_s20 = sadd.s32 1, %s991_s20   ;;  %s1308_s15 = smov %s975_s16 }
 0x263   : > { %p18_p9 = scmp.ge.s32.totalorder %s21_s20, 4   ;;  %s1309_s16 = smov %s979_s17 }
 0x264   : > { %s1310_s17 = smov %s1079_s27  ;;  %s1311_s18 = smov %s987_s19 }
 0x265   : > { %s1312_s19 = smov %s1314_s22  ;;  %20 = sbr.rel (!%p18_p9) target bundleno = 7 (0x7), region = 92 }
 0x26c   :  { %522 = vsyncpa [#allocation3], 1 }
 0x26d   :  { %524 = vsyncpa [#allocation3 + $0x1], 1 }
 0x26e   :  { %525 = vsyncpa [#allocation6], 1 }
 0x26f   :  { %527 = vsyncpa [#allocation6 + $0x1], 1 }
 0x270   :  { %528 = vsyncpa [#allocation4], 1 }
 0x271   :  { %530 = vsyncpa [#allocation4 + $0x1], 1 }

</bundles_post_ra>
